<compile_context>
chip_gen: v5e
topology: v5e:2x2
jax: 0.10.0
libtpu: 0.0.40
codegen_flags: <defaults>
</compile_context>

<pallas_src>
import jax
import jax.numpy as jnp
from jax import lax
from jax.experimental import pallas as pl
from jax.experimental.pallas import tpu as pltpu


def _round_up(x, m):
    return ((x + m - 1) // m) * m


def decoder_kernel(x_ref, zb_ref,
                   w1x_ref, w2_ref, b2_ref, w3_ref, b3_ref,
                   whead_ref, bhead_ref,
                   out_ref):
    """One (batch, row-tile) step of the decoder MLP in transposed layout.

    x_ref     : [1, t_dim, tm]   target points; rows on the lane axis
    zb_ref    : [1, h_dim, 1]    z @ W1z + b1 for this batch element
    w1x_ref   : [h_dim, t_dim]
    w2_ref    : [h_dim, h_dim]   b2_ref : [h_dim, 1]
    w3_ref    : [h_dim, h_dim]   b3_ref : [h_dim, 1]
    whead_ref : [2*y, h_dim]     bhead_ref : [2*y, 1]   (mu head | sigma head)
    out_ref   : [1, 2*y, tm]     rows [0,y) = mu, rows [y,2y) = softplus(sigma-head)
    """
    y_dim = out_ref.shape[1] // 2

    x = x_ref[0]          # (t_dim, tm)
    zb = zb_ref[0]        # (h_dim, 1)

    h = jnp.dot(w1x_ref[...], x, preferred_element_type=jnp.float32) + zb
    h = jnp.maximum(h, 0.0)
    h = jnp.dot(w2_ref[...], h, preferred_element_type=jnp.float32) + b2_ref[...]
    h = jnp.maximum(h, 0.0)
    h = jnp.dot(w3_ref[...], h, preferred_element_type=jnp.float32) + b3_ref[...]
    h = jnp.maximum(h, 0.0)

    # Fused mu|sigma head: one MXU push, one lane-dense output block.
    out = jnp.dot(whead_ref[...], h, preferred_element_type=jnp.float32) + bhead_ref[...]

    # Numerically-stable softplus, applied only to the sigma rows (sublane mask).
    sp = jnp.maximum(out, 0.0) + jnp.log1p(jnp.exp(-jnp.abs(out)))
    row = lax.broadcasted_iota(jnp.int32, out.shape, 0)
    out_ref[0] = jnp.where(row < y_dim, out, sp).astype(out_ref.dtype)


def decoder_forward(x, z, params, *, block_rows=4096):
    """x: [B, N, t_dim], z: [B, z_dim] -> (mu, sigma), each [B, N, y_dim]."""
    w1, b1, w2, b2, w3, b3, wmu, bmu, wsig, bsig = params
    B, N, t_dim = x.shape
    h_dim = w1.shape[1]
    y_dim = wmu.shape[1]

    # ---- layout plumbing (tiny / O(input) work, outside the kernel) -------
    # 1) Never materialize concat(x, z) in HBM: split W1 and fold the per-batch
    #    z contribution (+ b1) into a [B, h_dim, 1] bias term.
    w1x = w1[:t_dim, :]                                  # (t_dim, h_dim)
    w1z = w1[t_dim:, :]                                  # (z_dim, h_dim)
    zb = jnp.dot(z, w1z, preferred_element_type=jnp.float32) + b1   # (B, h_dim)
    zb = zb.reshape(B, h_dim, 1)

    # 2) Transposed working layout: rows (N) on the lane axis, padded so the
    #    lane tile is a multiple of 128 and no block is partial.
    if N <= block_rows:
        tm = _round_up(N, 128)
        n_pad = tm
    else:
        tm = block_rows                                  # multiple of 128
        n_pad = _round_up(N, tm)
    x_p = jnp.pad(x, ((0, 0), (0, n_pad - N), (0, 0)))   # zero rows -> finite math
    x_t = jnp.transpose(x_p, (0, 2, 1))                  # (B, t_dim, n_pad)

    # Transposed (tiny) weights; mu|sigma heads fused into one weight/bias.
    w1x_t = w1x.T                                        # (h_dim, t_dim)
    w2_t, w3_t = w2.T, w3.T                              # (h_dim, h_dim)
    b2_t, b3_t = b2.reshape(h_dim, 1), b3.reshape(h_dim, 1)
    whead_t = jnp.concatenate([wmu, wsig], axis=1).T     # (2*y_dim, h_dim)
    bhead_t = jnp.concatenate([bmu, bsig], axis=1).reshape(2 * y_dim, 1)

    grid = (B, n_pad // tm)

    def rep(a):  # whole (tiny) array, re-used by every grid step
        return pl.BlockSpec(a.shape, lambda b, n: (0,) * a.ndim)

    out = pl.pallas_call(
        decoder_kernel,
        out_shape=jax.ShapeDtypeStruct((B, 2 * y_dim, n_pad), jnp.float32),
        grid=grid,
        in_specs=[
            pl.BlockSpec((1, t_dim, tm), lambda b, n: (b, 0, n)),
            pl.BlockSpec((1, h_dim, 1), lambda b, n: (b, 0, 0)),
            rep(w1x_t),
            rep(w2_t), rep(b2_t),
            rep(w3_t), rep(b3_t),
            rep(whead_t), rep(bhead_t),
        ],
        out_specs=pl.BlockSpec((1, 2 * y_dim, tm), lambda b, n: (b, 0, n)),
        compiler_params=pltpu.CompilerParams(
            dimension_semantics=("parallel", "parallel"),
            # Explicit scoped-VMEM budget: raises v5e's 16 MiB default, stays
            # well inside v7x's 64 MiB physical.  Actual per-step footprint at
            # tm=4096 is only a few MiB (lane-dense blocks, narrow feature dims).
            vmem_limit_bytes=32 * 1024 * 1024,
        ),
    )(x_t, zb, w1x_t, w2_t, b2_t, w3_t, b3_t, whead_t, bhead_t)

    out = jnp.swapaxes(out[:, :, :N], 1, 2)              # (B, N, 2*y_dim)
    return out[..., :y_dim], out[..., y_dim:]


def init_params(key, t_dim, z_dim, h_dim, y_dim):
    """Deterministic synthetic parameters (PyTorch-like uniform init)."""
    ks = jax.random.split(key, 10)
    in_dim = t_dim + z_dim

    def lin(kw, kb, fan_in, fan_out):
        bound = 1.0 / jnp.sqrt(fan_in)
        w = jax.random.uniform(kw, (fan_in, fan_out), jnp.float32, -bound, bound)
        b = jax.random.uniform(kb, (1, fan_out), jnp.float32, -bound, bound)
        return w, b

    w1, b1 = lin(ks[0], ks[1], in_dim, h_dim)
    w2, b2 = lin(ks[2], ks[3], h_dim, h_dim)
    w3, b3 = lin(ks[4], ks[5], h_dim, h_dim)
    wmu, bmu = lin(ks[6], ks[7], h_dim, y_dim)
    wsig, bsig = lin(ks[8], ks[9], h_dim, y_dim)
    return (w1, b1, w2, b2, w3, b3, wmu, bmu, wsig, bsig)


def decoder_ref(x, z, params):
    """Pure-JAX reference (matches the PyTorch forward)."""
    w1, b1, w2, b2, w3, b3, wmu, bmu, wsig, bsig = params
    B, N, t_dim = x.shape
    z_dim = z.shape[1]
    x_flat = x.reshape(B * N, t_dim)
    z_flat = jnp.broadcast_to(z[:, None, :], (B, N, z_dim)).reshape(B * N, z_dim)
    xz = jnp.concatenate([x_flat, z_flat], axis=1)
    h = jnp.maximum(xz @ w1 + b1, 0.0)
    h = jnp.maximum(h @ w2 + b2, 0.0)
    h = jnp.maximum(h @ w3 + b3, 0.0)
    mu = h @ wmu + bmu
    pre_sigma = h @ wsig + bsig
    # NOTE: in the PyTorch module `sigma = 0.1 + 0.9*softplus(...)` is
    # immediately overwritten by `sigma = softplus(...)`; we reproduce that.
    sigma = jax.nn.softplus(pre_sigma)
    y_dim = wmu.shape[1]
    return mu.reshape(B, N, y_dim), sigma.reshape(B, N, y_dim)


if __name__ == "__main__":
    # dimensions = {'t_dim': 2, 'z_dim': 8, 'h_dim': 32, 'y_dim': 2}
    t_dim, z_dim, h_dim, y_dim = 2, 8, 32, 2
    batch, num_points = 2, 200   # small; exercises the pad-to-128 + slice path

    key = jax.random.PRNGKey(0)
    kx, kz, kp = jax.random.split(key, 3)
    x = jax.random.normal(kx, (batch, num_points, t_dim), dtype=jnp.float32)
    z = jax.random.normal(kz, (batch, z_dim), dtype=jnp.float32)
    params = init_params(kp, t_dim, z_dim, h_dim, y_dim)

    mu, sigma = decoder_forward(x, z, params)
    mu = jax.block_until_ready(mu)
    sigma = jax.block_until_ready(sigma)

    mu_ref, sigma_ref = decoder_ref(x, z, params)
    assert mu.shape == (batch, num_points, y_dim)
    assert sigma.shape == (batch, num_points, y_dim)
    assert jnp.allclose(mu, mu_ref, atol=1e-4, rtol=1e-4)
    assert jnp.allclose(sigma, sigma_ref, atol=1e-4, rtol=1e-4)

    print("KERNEL_OK")
</pallas_src>

<mosaic_0001>
module attributes {stable_mosaic.version = 11 : i64} {
  func.func @decoder_kernel(%arg0: i32, %arg1: i32, %arg2: memref<1x2x256xf32, #tpu.memory_space<vmem>>, %arg3: memref<1x32x1xf32, #tpu.memory_space<vmem>>, %arg4: memref<32x2xf32, #tpu.memory_space<vmem>>, %arg5: memref<32x32xf32, #tpu.memory_space<vmem>>, %arg6: memref<32x1xf32, #tpu.memory_space<vmem>>, %arg7: memref<32x32xf32, #tpu.memory_space<vmem>>, %arg8: memref<32x1xf32, #tpu.memory_space<vmem>>, %arg9: memref<4x32xf32, #tpu.memory_space<vmem>>, %arg10: memref<4x1xf32, #tpu.memory_space<vmem>>, %arg11: memref<1x4x256xf32, #tpu.memory_space<vmem>>) attributes {dimension_semantics = [#tpu.dimension_semantics<parallel>, #tpu.dimension_semantics<parallel>], iteration_bounds = array<i64: 2, 1>, scalar_prefetch = 0 : i64, scratch_operands = 0 : i64, tpu.core_type = #tpu.core_type<tc>, window_params = [{transform_indices = @transform_0, window_bounds = array<i64: 1, 2, 256>}, {transform_indices = @transform_1, window_bounds = array<i64: 1, 32, 1>}, {pipeline_mode = #tpu.pipeline_mode<synchronous>, transform_indices = @transform_2, window_bounds = array<i64: 32, 2>}, {pipeline_mode = #tpu.pipeline_mode<synchronous>, transform_indices = @transform_3, window_bounds = array<i64: 32, 32>}, {pipeline_mode = #tpu.pipeline_mode<synchronous>, transform_indices = @transform_4, window_bounds = array<i64: 32, 1>}, {pipeline_mode = #tpu.pipeline_mode<synchronous>, transform_indices = @transform_5, window_bounds = array<i64: 32, 32>}, {pipeline_mode = #tpu.pipeline_mode<synchronous>, transform_indices = @transform_6, window_bounds = array<i64: 32, 1>}, {pipeline_mode = #tpu.pipeline_mode<synchronous>, transform_indices = @transform_7, window_bounds = array<i64: 4, 32>}, {pipeline_mode = #tpu.pipeline_mode<synchronous>, transform_indices = @transform_8, window_bounds = array<i64: 4, 1>}, {transform_indices = @transform_9, window_bounds = array<i64: 1, 4, 256>}]} {
    %c0 = arith.constant 0 : index
    %c0_0 = arith.constant 0 : index
    %c0_1 = arith.constant 0 : index
    %0 = vector.load %arg2[%c0, %c0_0, %c0_1] : memref<1x2x256xf32, #tpu.memory_space<vmem>>, vector<1x2x256xf32>
    %1 = vector.shape_cast %0 : vector<1x2x256xf32> to vector<2x256xf32>
    %c0_2 = arith.constant 0 : index
    %c0_3 = arith.constant 0 : index
    %c0_4 = arith.constant 0 : index
    %2 = vector.load %arg3[%c0_2, %c0_3, %c0_4] : memref<1x32x1xf32, #tpu.memory_space<vmem>>, vector<1x32x1xf32>
    %3 = vector.shape_cast %2 : vector<1x32x1xf32> to vector<32x1xf32>
    %c0_5 = arith.constant 0 : index
    %c0_6 = arith.constant 0 : index
    %4 = vector.load %arg4[%c0_5, %c0_6] : memref<32x2xf32, #tpu.memory_space<vmem>>, vector<32x2xf32>
    %cst = arith.constant dense<0.000000e+00> : vector<32x256xf32>
    %5 = tpu.matmul %4, %1, %cst {dimension_numbers = #tpu.dot_dimension_numbers<[1], [0], [0], [1], [0, 0, 1, 1], [], []>} : vector<32x2xf32>, vector<2x256xf32>, vector<32x256xf32> -> vector<32x256xf32>
    %6 = vector.broadcast %3 : vector<32x1xf32> to vector<32x256xf32>
    %7 = arith.addf %5, %6 : vector<32x256xf32>
    %cst_7 = arith.constant 0.000000e+00 : f32
    %8 = vector.broadcast %cst_7 : f32 to vector<32x256xf32>
    %9 = arith.maximumf %7, %8 : vector<32x256xf32>
    %c0_8 = arith.constant 0 : index
    %c0_9 = arith.constant 0 : index
    %10 = vector.load %arg5[%c0_8, %c0_9] : memref<32x32xf32, #tpu.memory_space<vmem>>, vector<32x32xf32>
    %cst_10 = arith.constant dense<0.000000e+00> : vector<32x256xf32>
    %11 = tpu.matmul %10, %9, %cst_10 {dimension_numbers = #tpu.dot_dimension_numbers<[1], [0], [0], [1], [0, 0, 1, 1], [], []>} : vector<32x32xf32>, vector<32x256xf32>, vector<32x256xf32> -> vector<32x256xf32>
    %c0_11 = arith.constant 0 : index
    %c0_12 = arith.constant 0 : index
    %12 = vector.load %arg6[%c0_11, %c0_12] : memref<32x1xf32, #tpu.memory_space<vmem>>, vector<32x1xf32>
    %13 = vector.broadcast %12 : vector<32x1xf32> to vector<32x256xf32>
    %14 = arith.addf %11, %13 : vector<32x256xf32>
    %cst_13 = arith.constant 0.000000e+00 : f32
    %15 = vector.broadcast %cst_13 : f32 to vector<32x256xf32>
    %16 = arith.maximumf %14, %15 : vector<32x256xf32>
    %c0_14 = arith.constant 0 : index
    %c0_15 = arith.constant 0 : index
    %17 = vector.load %arg7[%c0_14, %c0_15] : memref<32x32xf32, #tpu.memory_space<vmem>>, vector<32x32xf32>
    %cst_16 = arith.constant dense<0.000000e+00> : vector<32x256xf32>
    %18 = tpu.matmul %17, %16, %cst_16 {dimension_numbers = #tpu.dot_dimension_numbers<[1], [0], [0], [1], [0, 0, 1, 1], [], []>} : vector<32x32xf32>, vector<32x256xf32>, vector<32x256xf32> -> vector<32x256xf32>
    %c0_17 = arith.constant 0 : index
    %c0_18 = arith.constant 0 : index
    %19 = vector.load %arg8[%c0_17, %c0_18] : memref<32x1xf32, #tpu.memory_space<vmem>>, vector<32x1xf32>
    %20 = vector.broadcast %19 : vector<32x1xf32> to vector<32x256xf32>
    %21 = arith.addf %18, %20 : vector<32x256xf32>
    %cst_19 = arith.constant 0.000000e+00 : f32
    %22 = vector.broadcast %cst_19 : f32 to vector<32x256xf32>
    %23 = arith.maximumf %21, %22 : vector<32x256xf32>
    %c0_20 = arith.constant 0 : index
    %c0_21 = arith.constant 0 : index
    %24 = vector.load %arg9[%c0_20, %c0_21] : memref<4x32xf32, #tpu.memory_space<vmem>>, vector<4x32xf32>
    %cst_22 = arith.constant dense<0.000000e+00> : vector<4x256xf32>
    %25 = tpu.matmul %24, %23, %cst_22 {dimension_numbers = #tpu.dot_dimension_numbers<[1], [0], [0], [1], [0, 0, 1, 1], [], []>} : vector<4x32xf32>, vector<32x256xf32>, vector<4x256xf32> -> vector<4x256xf32>
    %c0_23 = arith.constant 0 : index
    %c0_24 = arith.constant 0 : index
    %26 = vector.load %arg10[%c0_23, %c0_24] : memref<4x1xf32, #tpu.memory_space<vmem>>, vector<4x1xf32>
    %27 = vector.broadcast %26 : vector<4x1xf32> to vector<4x256xf32>
    %28 = arith.addf %25, %27 : vector<4x256xf32>
    %cst_25 = arith.constant 0.000000e+00 : f32
    %29 = vector.broadcast %cst_25 : f32 to vector<4x256xf32>
    %30 = arith.maximumf %28, %29 : vector<4x256xf32>
    %31 = math.absf %28 : vector<4x256xf32>
    %cst_26 = arith.constant 0.000000e+00 : f32
    %32 = vector.broadcast %cst_26 : f32 to vector<4x256xf32>
    %33 = arith.subf %32, %31 : vector<4x256xf32>
    %34 = math.exp %33 : vector<4x256xf32>
    %35 = math.log1p %34 : vector<4x256xf32>
    %36 = arith.addf %30, %35 : vector<4x256xf32>
    %37 = tpu.iota {dimensions = array<i32: 0>} : vector<4x256xi32>
    %c2_i32 = arith.constant 2 : i32
    %38 = vector.broadcast %c2_i32 : i32 to vector<4x256xi32>
    %39 = arith.cmpi slt, %37, %38 : vector<4x256xi32>
    %40 = arith.select %39, %28, %36 : vector<4x256xi1>, vector<4x256xf32>
    %c0_27 = arith.constant 0 : index
    %c0_28 = arith.constant 0 : index
    %c0_29 = arith.constant 0 : index
    %41 = vector.load %arg11[%c0_27, %c0_28, %c0_29] : memref<1x4x256xf32, #tpu.memory_space<vmem>>, vector<1x4x256xf32>
    %42 = vector.shape_cast %41 : vector<1x4x256xf32> to vector<4x256xf32>
    %43 = vector.shape_cast %40 : vector<4x256xf32> to vector<1x4x256xf32>
    tpu.vector_store %arg11[%c0_27, %c0_28, %c0_29], %43 {strides = array<i32>} : memref<1x4x256xf32, #tpu.memory_space<vmem>>, vector<1x4x256xf32>,
    return
  }
  func.func @transform_0(%arg0: i32, %arg1: i32) -> (i32, i32, i32) {
    %c0_i32 = arith.constant 0 : i32
    %c0_i32_0 = arith.constant 0 : i32
    return %arg0, %c0_i32, %arg1 : i32, i32, i32
  }
  func.func @transform_1(%arg0: i32, %arg1: i32) -> (i32, i32, i32) {
    %c0_i32 = arith.constant 0 : i32
    %c0_i32_0 = arith.constant 0 : i32
    %c0_i32_1 = arith.constant 0 : i32
    return %arg0, %c0_i32, %c0_i32_0 : i32, i32, i32
  }
  func.func @transform_2(%arg0: i32, %arg1: i32) -> (i32, i32) {
    %c0_i32 = arith.constant 0 : i32
    %c0_i32_0 = arith.constant 0 : i32
    %c0_i32_1 = arith.constant 0 : i32
    return %c0_i32, %c0_i32_0 : i32, i32
  }
  func.func @transform_3(%arg0: i32, %arg1: i32) -> (i32, i32) {
    %c0_i32 = arith.constant 0 : i32
    %c0_i32_0 = arith.constant 0 : i32
    %c0_i32_1 = arith.constant 0 : i32
    return %c0_i32, %c0_i32_0 : i32, i32
  }
  func.func @transform_4(%arg0: i32, %arg1: i32) -> (i32, i32) {
    %c0_i32 = arith.constant 0 : i32
    %c0_i32_0 = arith.constant 0 : i32
    %c0_i32_1 = arith.constant 0 : i32
    return %c0_i32, %c0_i32_0 : i32, i32
  }
  func.func @transform_5(%arg0: i32, %arg1: i32) -> (i32, i32) {
    %c0_i32 = arith.constant 0 : i32
    %c0_i32_0 = arith.constant 0 : i32
    %c0_i32_1 = arith.constant 0 : i32
    return %c0_i32, %c0_i32_0 : i32, i32
  }
  func.func @transform_6(%arg0: i32, %arg1: i32) -> (i32, i32) {
    %c0_i32 = arith.constant 0 : i32
    %c0_i32_0 = arith.constant 0 : i32
    %c0_i32_1 = arith.constant 0 : i32
    return %c0_i32, %c0_i32_0 : i32, i32
  }
  func.func @transform_7(%arg0: i32, %arg1: i32) -> (i32, i32) {
    %c0_i32 = arith.constant 0 : i32
    %c0_i32_0 = arith.constant 0 : i32
    %c0_i32_1 = arith.constant 0 : i32
    return %c0_i32, %c0_i32_0 : i32, i32
  }
  func.func @transform_8(%arg0: i32, %arg1: i32) -> (i32, i32) {
    %c0_i32 = arith.constant 0 : i32
    %c0_i32_0 = arith.constant 0 : i32
    %c0_i32_1 = arith.constant 0 : i32
    return %c0_i32, %c0_i32_0 : i32, i32
  }
  func.func @transform_9(%arg0: i32, %arg1: i32) -> (i32, i32, i32) {
    %c0_i32 = arith.constant 0 : i32
    %c0_i32_0 = arith.constant 0 : i32
    return %arg0, %c0_i32, %arg1 : i32, i32, i32
  }
}

</mosaic_0001>

<bundles_post_ra>
// kernel: tpu_custom_call.1
= control target key start
LH: loop header
LB: loop body
LE: loop exit
PB: predicated region body
PF: predicated region fallthrough
CT: control target
= control target key end

     0   :  { %14 = vsyncpa [#allocation3], 0  ;;  %s1353_s0 = inlined_call_operand.vmem [shape: f32[2,2,256], index: 0, kind: input, shape index: {}]   ;;  %s1354_s1 = inlined_call_operand.vmem [shape: f32[2,32,1], index: 1, kind: input, shape index: {}]   ;;  %s1355_s2 = inlined_call_operand.vmem [shape: f32[32,2], index: 2, kind: input, shape index: {}]   ;;  %s1356_s3 = inlined_call_operand.vmem [shape: f32[32,32], index: 3, kind: input, shape index: {}]   ;;  %s1357_s4 = inlined_call_operand.vmem [shape: f32[32,1], index: 4, kind: input, shape index: {}]   ;;  %s1358_s5 = inlined_call_operand.vmem [shape: f32[32,32], index: 5, kind: input, shape index: {}]   ;;  %s1359_s6 = inlined_call_operand.vmem [shape: f32[32,1], index: 6, kind: input, shape index: {}]   ;;  %s1360_s7 = inlined_call_operand.vmem [shape: f32[4,32], index: 7, kind: input, shape index: {}]   ;;  %s1361_s8 = inlined_call_operand.vmem [shape: f32[4,1], index: 8, kind: input, shape index: {}]   ;;  %s1362_s9 = inlined_call_operand.hbm [shape: f32[2,4,256], index: 9, kind: output, shape index: {}]  }
   0x1   :  { %16 = vsyncpa [#allocation3 + $0x1], 0  ;;  %s1157_s30 = smov 0   ;;  %s1159_s10 = smov 0  }
   0x2   :  { %s1161_s11 = smov 0   ;;  %s1163_s12 = smov 0  }
   0x3   :  { %s1165_s13 = smov 0   ;;  %s1167_s14 = smov 0  }
   0x4 LB: > { %s911_s15 = sadd.s32 4294967295, %s1104_s14   ;;  %s912_s16 = sadd.s32 4294967294, %s1104_s14   ;;  %s1104_s14 = sphi %s1167_s14, %s22_s14   ;;  %s1100_s13 = sphi %s1165_s13, %s1369_s13   ;;  %s1096_s12 = sphi %s1163_s12, %s1368_s12   ;;  %s1092_s11 = sphi %s1161_s11, %s1367_s11   ;;  %s1088_s10 = sphi %s1159_s10, %s1366_s10   ;;  %s1084_s30 = sphi %s1157_s30, %s1365_s30  }
   0x5   : > { %s34_s17 = sadd.s32 1, %s1100_s13  ;;  %s244_s18 = sadd.s32 1, %s1092_s11 }
   0x6   : > { %p36_p0 = scmp.ge.s32.totalorder %s34_s17, 2  ;;  %p254_p1 = scmp.ne.s32.totalorder %s1092_s11, %s1088_s10 }
   0x7   : > { %p255_p2 = scmp.eq.s32.totalorder %s911_s15, 1  ;;  %p260_p3 = scmp.ne.s32.totalorder %s1088_s10, %s1084_s30 }
   0x8   : > { %s1371_s17 = smov (%p36_p0, %s34_s17), 0  ;;  %p261_p5 = scmp.eq.s32.totalorder %s912_s16, 1 }
   0x9   : > { %p1197_p4 = por %p255_p2, %p254_p1  ;;  %s239_s20 = ssub.s32 %s1100_s13, %s1371_s17 }
   0xa   : > { %p915_p6 = scmp.ge.s32.totalorder %s1104_s14, 1  ;;  %p242_p7 = scmp.eq.s32.totalorder %s239_s20, 0 }
   0xb   : > { %p1204_p8 = por %p261_p5, %p260_p3  ;;  %p321_p9 = scmp.lt.s32.totalorder %s1104_s14, 3 }
   0xc   : > { %s1210_s22 = scalar_select %p242_p7, %s1092_s11, %s244_s18  }
   0xd   : > { %p322_p10 = pnand %p915_p6, %p321_p9 }
   0xe   : > { %p367_p11 = scmp.lt.s32.totalorder (!%p322_p10), %s1096_s12, 1  ;;  %s363_s18 = sand.u32 (!%p322_p10), 1, %s1088_s10  }
   0xf   : > { %325 = sbr.rel (%p322_p10) target bundleno = 682 (0x2aa), region = 56  ;;  %s916_s20 = sshll.u32 (!%p322_p10), %s363_s18, 3 }
  0x14   : > { %v1106_v0 = vmov 0   ;;  %s368_s23 = scalar_select %p367_p11, %s1096_s12, 1  ;;  %vm428_vm0 = vcmask 1041408   ;;  %v387_v5 = vld [vmem:[%s1355_s2] sm:$0xff]  ;;  %vm415_vm1 = vcmask 15360   ;;  %v390_v8 = vld [vmem:[%s1355_s2 + $0x18] sm:$0xff] }
  0x15   : > { %1015 = vset.pattern.permute.xlu0 %v1106_v0  ;;  %1016 = vset.pattern.permute.xlu1 %v1106_v0  ;;  %v504_v10 = vld [vmem:[%s1357_s4 + $0x8] sm:$0xff]  ;;  %v503_v12 = vld [vmem:[%s1357_s4] sm:$0xff]  ;;  %v612_v13 = vld [vmem:[%s1359_s6 + $0x10] sm:$0xff]  ;;  %vm527_vm2 = vcmask 261120   ;;  %vm800_vm6 = vcmask 1043456  }
  0x16   : > { %1017 = vset.pattern.permute.xlu2 %v1106_v0  ;;  %s955_s24 = sshll.u32 %s368_s23, 5  ;;  %s954_s25 = sshll.u32 %s368_s23, 2  ;;  %v388_v11 = vld [vmem:[%s1355_s2 + $0x8] sm:$0xff]  ;;  %v389_v14 = vld [vmem:[%s1355_s2 + $0x10] sm:$0xff]  ;;  %v713_v16 = vld [vmem:[%s1361_s8] sm:$0xf] }
  0x17   : > { %s380_s28 = scalar_lea.vmem %s1354_s1, %s955_s24  ;;  %s374_s16 = scalar_lea.vmem %s1353_s0, %s954_s25  ;;  %v611_v15 = vld [vmem:[%s1359_s6 + $0x8] sm:$0xff]  ;;  %v506_v39 = vld [vmem:[%s1357_s4 + $0x18] sm:$0xff]  ;;  %v499_v45 = vld [vmem:[%s1356_s3] sm:$0xff] }
  0x18   : > { %v386_v1 = vld [vmem:[%s380_s28 + $0x18] sm:$0xff]  ;;  %v382_v2 = vld [vmem:[%s374_s16] sm:$0xf]  ;;  %v384_v3 = vld [vmem:[%s380_s28 + $0x8] sm:$0xff]  ;;  %524 = vperm.xlu2 %1017, %v506_v39   ;;  %s956_s23 = sshll.u32 %s1096_s12, 3  ;;  %s365_s12 = scalar_lea.vmem [#allocation2], %s916_s20 }
  0x19   : > { %408 = vperm.xlu0 %1015, %v386_v1   ;;  %412 = vst [vmem:[#allocation1] ss:$4 sm:$0xff] %v382_v2  ;;  %398 = vperm.xlu1 %1016, %v384_v3   ;;  %v385_v4 = vld [vmem:[%s380_s28 + $0x10] sm:$0xff]  ;;  %v383_v9 = vld [vmem:[%s380_s28] sm:$0xff]  ;;  %v500_v48 = vld [vmem:[%s1356_s3 + $0x8] sm:$0xff]  ;;  %s818_s26 = scalar_lea.hbm %s1362_s9, %s956_s23  ;;  %s820_s27 = sshll.u32 %s365_s12, 4  ;;  %s821_s27 = int_to_ptr.vmem [resolvable:$true] %s820_s27 }
  0x1a   : > { %v505_v47 = vld [vmem:[%s1357_s4 + $0x10] sm:$0xff]  ;;  %v613_v49 = vld [vmem:[%s1359_s6 + $0x18] sm:$0xff]  ;;  %v610_v51 = vld [vmem:[%s1359_s6] sm:$0xff]  ;;  %s822_s29 = sshll.u32 %s818_s26, 4  ;;  %s805_s28 = scalar_lea.sflag [#allocation3], %s363_s18  ;;  %s823_s29 = int_to_ptr.hbm [resolvable:$true] %s822_s29 }
  0x1b   : > { %v501_v50 = vld [vmem:[%s1356_s3 + $0x10] sm:$0xff]  ;;  %v502_v52 = vld [vmem:[%s1356_s3 + $0x18] sm:$0xff]  ;;  %s1040_s15 = sshra.s32 %s823_s29, 4  ;;  %s1046_s24 = scalar_lea.hbm %s1362_s9, 16  ;;  %s1041_s15 = int_to_ptr.hbm [resolvable:$true] %s1040_s15 }
  0x1c   : > { %s1042_s16 = scalar_lea.hbm %s1041_s15, 8  ;;  %p1047_p1 = scmp.lt.s32.totalorder %s1041_s15, %s1362_s9 }
  0x1d   : > { %p1043_p12 = scmp.ne.s32.totalorder %s1041_s15, %s1042_s16  ;;  %p1048_p2 = scmp.lt.s32.totalorder %s1046_s24, %s1042_s16 }
  0x1f   : > { %p1044_p13 = pnand %p1043_p12, %p1197_p4  ;;  %p1049_p3 = por %p1048_p2, %p1047_p1 }
  0x20   : > { %v413_v6 = vld.sshfl [vmem:[#allocation1] sm:$0xff pattern:$0x73625140]  ;;  %v414_v7 = vld.sshfl [vmem:[#allocation1 + $0x8] sm:$0xff pattern:$0x73625140]  ;;  %519 = vperm.xlu2 %1017, %v505_v47  }
  0x21   : > { %403 = vperm.xlu0 %1015, %v385_v4   ;;  %921 = vmatpush.msk.msra.mxu0 %vm428_vm0, %v413_v6  ;;  %p1045_p0 = pneg %p1044_p13 }
  0x22   : > { %926 = vmatpush.msk.msra.mxu1 %vm428_vm0, %v414_v7  ;;  %922 = vmatmul.msk.f32.vlgmr.msra.gmra.mxu0 %vm415_vm1, %v387_v5 }
  0x23   : > { %927 = vmatmul.msk.f32.vlgmr.msra.gmra.mxu1 %vm415_vm1, %v387_v5  ;;  %957 = vmatpush.msk.msra.mxu2 %vm428_vm0, %v413_v6  ;;  %p1050_p5 = pnand %p1049_p3, %p1045_p0 }
  0x24   : > { %958 = vmatpush.msk.msra.mxu3 %vm428_vm0, %v414_v7  ;;  %925 = vmatmul.msk.f32.vlgmr.msra.gmra.mxu2 %vm415_vm1, %v390_v8 }
  0x25   : > { %930 = vmatmul.msk.f32.vlgmr.msra.gmra.mxu3 %vm415_vm1, %v390_v8  ;;  %393 = vperm.xlu1 %1016, %v383_v9  }
  0x28   : > { %631 = vperm.xlu2 %1017, %v613_v49  }
  0x29   : > { %514 = vperm.xlu0 %1015, %v504_v10  }
  0x2a   : > { %923 = vmatmul.msk.f32.gmra.mxu0 %vm415_vm1, %v388_v11 }
  0x2b   : > { %928 = vmatmul.msk.f32.gmra.mxu1 %vm415_vm1, %v388_v11 }
  0x2d   : > { %509 = vperm.xlu1 %1016, %v503_v12  }
  0x30   : > { %616 = vperm.xlu2 %1017, %v610_v51  }
  0x31   : > { %626 = vperm.xlu0 %1015, %v612_v13  }
  0x32   : > { %924 = vmatmul.msk.f32.gmra.mxu0 %vm415_vm1, %v389_v14 }
  0x33   : > { %929 = vmatmul.msk.f32.gmra.mxu1 %vm415_vm1, %v389_v14 }
  0x35   : > { %621 = vperm.xlu1 %1016, %v611_v15  }
  0x39   : > { %716 = vperm.xlu0 %1015, %v713_v16   ;;  %v606_v16 = vld [vmem:[%s1358_s5] sm:$0xff] }
  0x72   : > { %v525_v57 = vpop.permute.xlu2 %524 }
  0x7a   : > { %v520_v60 = vpop.permute.xlu2 %519 }
  0x8b   : > { %v409_v19 = vpop.permute.xlu0 %408  ;;  %v399_v20 = vpop.permute.xlu1 %398 }
  0x93   : > { %v404_v29 = vpop.permute.xlu0 %403 }
  0x97   : > { %v394_v34 = vpop.permute.xlu1 %393 }
  0x9b   : > { %v515_v1 = vpop.permute.xlu0 %514 }
  0x9f   : > { %v450_v17 = vpop.f32.mrf.mxu0  ;;  %v510_v6 = vpop.permute.xlu1 %509 }
  0xa0   : > { %v479_v18 = vpop.f32.mrf.mxu1  ;;  %v451_v37 = vadd.f32 %v450_v17, %v394_v34 }
  0xa1   : > { %v480_v40 = vadd.f32 %v479_v18, %v394_v34  ;;  %v607_v18 = vld [vmem:[%s1358_s5 + $0x8] sm:$0xff] }
  0xa2   : > { %v491_v44 = vmax.f32 %v451_v37, 0.0 }
  0xa3   : > { %v492_v46 = vmax.f32 %v480_v40, 0.0 }
  0xa7   : > { %v453_v21 = vpop.f32.mrf.mxu0  ;;  %v459_v22 = vpop.f32.mrf.mxu2 }
  0xa8   : > { %v460_v23 = vadd.f32 %v459_v22, %v409_v19  ;;  %v482_v24 = vpop.f32.mrf.mxu1  ;;  %v488_v25 = vpop.f32.mrf.mxu3  ;;  %v454_v31 = vadd.f32 %v453_v21, %v399_v20 }
  0xa9   : > { %v489_v26 = vadd.f32 %v488_v25, %v409_v19  ;;  %v483_v35 = vadd.f32 %v482_v24, %v399_v20  ;;  %v608_v19 = vld [vmem:[%s1358_s5 + $0x10] sm:$0xff]  ;;  %v609_v20 = vld [vmem:[%s1358_s5 + $0x18] sm:$0xff] }
  0xaa   : > { %v497_v27 = vmax.f32 %v460_v23, 0.0  ;;  %v493_v42 = vmax.f32 %v454_v31, 0.0 }
  0xab   : > { %v498_v28 = vmax.f32 %v489_v26, 0.0  ;;  %v494_v43 = vmax.f32 %v483_v35, 0.0 }
  0xac   : > { %552 = vmatpush.msrb.mxu2 %v497_v27  ;;  %v632_v27 = vpop.permute.xlu2 %631 }
  0xad   : > { %581 = vmatpush.msrb.mxu3 %v498_v28  ;;  %v627_v28 = vpop.permute.xlu0 %626 }
  0xaf   : > { %v456_v30 = vpop.f32.mrf.mxu0 }
  0xb0   : > { %v457_v32 = vadd.f32 %v456_v30, %v404_v29  ;;  %v485_v33 = vpop.f32.mrf.mxu1 }
  0xb1   : > { %v486_v36 = vadd.f32 %v485_v33, %v404_v29  ;;  %v622_v33 = vpop.permute.xlu1 %621 }
  0xb2   : > { %v495_v38 = vmax.f32 %v457_v32, 0.0 }
  0xb3   : > { %v496_v41 = vmax.f32 %v486_v36, 0.0 }
  0xb4   : > { %553 = vmatpush.msrb.mxu2 %v495_v38  ;;  %v617_v38 = vpop.permute.xlu2 %616 }
  0xb5   : > { %582 = vmatpush.msrb.mxu3 %v496_v41 }
  0xb6   : > { %554 = vmatpush.msrb.mxu2 %v493_v42 }
  0xb7   : > { %583 = vmatpush.msrb.mxu3 %v494_v43 }
  0xb8   : > { %555 = vmatpush.msrb.mxu2 %v491_v44 }
  0xb9   : > { %584 = vmatpush.msrb.mxu3 %v492_v46  ;;  %931 = vmatmul.msk.f32.vlgmr.msrb.gmra.mxu2 %vm527_vm2, %v499_v45 }
  0xba   : > { %935 = vmatmul.msk.f32.vlgmr.msrb.gmra.mxu3 %vm527_vm2, %v499_v45 }
  0xc1   : > { %932 = vmatmul.msk.f32.gmra.mxu2 %vm527_vm2, %v500_v48 }
  0xc2   : > { %936 = vmatmul.msk.f32.gmra.mxu3 %vm527_vm2, %v500_v48  ;;  %v712_v48 = vld [vmem:[%s1360_s7] sm:$0xf] }
  0xc9   : > { %933 = vmatmul.msk.f32.gmra.mxu2 %vm527_vm2, %v501_v50 }
  0xca   : > { %937 = vmatmul.msk.f32.gmra.mxu3 %vm527_vm2, %v501_v50  ;;  %v717_v50 = vpop.permute.xlu0 %716 }
  0xd1   : > { %934 = vmatmul.msk.f32.gmra.mxu2 %vm527_vm2, %v502_v52 }
  0xd2   : > { %938 = vmatmul.msk.f32.gmra.mxu3 %vm527_vm2, %v502_v52 }
 0x13c   : > { %v557_v53 = vpop.f32.mrf.mxu2 }
 0x13d   : > { %v586_v54 = vpop.f32.mrf.mxu3  ;;  %v558_v9 = vadd.f32 %v557_v53, %v510_v6 }
 0x13e   : > { %v587_v11 = vadd.f32 %v586_v54, %v510_v6 }
 0x13f   : > { %v598_v15 = vmax.f32 %v558_v9, 0.0 }
 0x140   : > { %v599_v17 = vmax.f32 %v587_v11, 0.0 }
 0x144   : > { %v560_v55 = vpop.f32.mrf.mxu2 }
 0x145   : > { %v589_v56 = vpop.f32.mrf.mxu3  ;;  %v561_v4 = vadd.f32 %v560_v55, %v515_v1 }
 0x146   : > { %v590_v7 = vadd.f32 %v589_v56, %v515_v1 }
 0x147   : > { %v600_v13 = vmax.f32 %v561_v4, 0.0 }
 0x148   : > { %v601_v14 = vmax.f32 %v590_v7, 0.0 }
 0x14c   : > { %v563_v58 = vpop.f32.mrf.mxu2 }
 0x14d   : > { %v592_v59 = vpop.f32.mrf.mxu3  ;;  %v564_v62 = vadd.f32 %v563_v58, %v520_v60 }
 0x14e   : > { %v593_v2 = vadd.f32 %v592_v59, %v520_v60 }
 0x14f   : > { %v602_v10 = vmax.f32 %v564_v62, 0.0 }
 0x150   : > { %v603_v12 = vmax.f32 %v593_v2, 0.0 }
 0x154   : > { %v566_v61 = vpop.f32.mrf.mxu2 }
 0x155   : > { %v567_v63 = vadd.f32 %v566_v61, %v525_v57  ;;  %v595_v0 = vpop.f32.mrf.mxu3 }
 0x156   : > { %v596_v3 = vadd.f32 %v595_v0, %v525_v57 }
 0x157   : > { %v604_v5 = vmax.f32 %v567_v63, 0.0 }
 0x158   : > { %v605_v8 = vmax.f32 %v596_v3, 0.0  ;;  %v792_v3 = vlaneseq }
 0x159   : > { %658 = vmatpush.msrb.mxu0 %v604_v5 }
 0x15a   : > { %687 = vmatpush.msrb.mxu1 %v605_v8  ;;  %v793_v9 = vshrl.u32 %v792_v3, 7 }
 0x15b   : > { %659 = vmatpush.msrb.mxu0 %v602_v10 }
 0x15c   : > { %688 = vmatpush.msrb.mxu1 %v603_v12  ;;  %vm794_vm5 = vcmp.lt.s32.totalorder %v793_v9, 2 }
 0x15d   : > { %660 = vmatpush.msrb.mxu0 %v600_v13 }
 0x15e   : > { %689 = vmatpush.msrb.mxu1 %v601_v14 }
 0x15f   : > { %661 = vmatpush.msrb.mxu0 %v598_v15 }
 0x160   : > { %690 = vmatpush.msrb.mxu1 %v599_v17  ;;  %939 = vmatmul.msk.f32.vlgmr.msrb.gmra.mxu0 %vm527_vm2, %v606_v16 }
 0x161   : > { %943 = vmatmul.msk.f32.vlgmr.msrb.gmra.mxu1 %vm527_vm2, %v606_v16 }
 0x168   : > { %940 = vmatmul.msk.f32.gmra.mxu0 %vm527_vm2, %v607_v18 }
 0x169   : > { %944 = vmatmul.msk.f32.gmra.mxu1 %vm527_vm2, %v607_v18 }
 0x170   : > { %941 = vmatmul.msk.f32.gmra.mxu0 %vm527_vm2, %v608_v19 }
 0x171   : > { %945 = vmatmul.msk.f32.gmra.mxu1 %vm527_vm2, %v608_v19 }
 0x178   : > { %942 = vmatmul.msk.f32.gmra.mxu0 %vm527_vm2, %v609_v20 }
 0x179   : > { %946 = vmatmul.msk.f32.gmra.mxu1 %vm527_vm2, %v609_v20 }
 0x1dd   : > { %v663_v21 = vpop.f32.mrf.mxu0 }
 0x1de   : > { %v692_v22 = vpop.f32.mrf.mxu1  ;;  %v664_v41 = vadd.f32 %v663_v21, %v617_v38 }
 0x1df   : > { %v693_v43 = vadd.f32 %v692_v22, %v617_v38 }
 0x1e0   : > { %v704_v47 = vmax.f32 %v664_v41, 0.0 }
 0x1e1   : > { %v705_v49 = vmax.f32 %v693_v43, 0.0 }
 0x1e5   : > { %v666_v23 = vpop.f32.mrf.mxu0 }
 0x1e6   : > { %v695_v24 = vpop.f32.mrf.mxu1  ;;  %v667_v36 = vadd.f32 %v666_v23, %v622_v33 }
 0x1e7   : > { %v696_v39 = vadd.f32 %v695_v24, %v622_v33 }
 0x1e8   : > { %v706_v45 = vmax.f32 %v667_v36, 0.0 }
 0x1e9   : > { %v707_v46 = vmax.f32 %v696_v39, 0.0 }
 0x1ed   : > { %v669_v25 = vpop.f32.mrf.mxu0 }
 0x1ee   : > { %v698_v26 = vpop.f32.mrf.mxu1  ;;  %v670_v30 = vadd.f32 %v669_v25, %v627_v28 }
 0x1ef   : > { %v699_v34 = vadd.f32 %v698_v26, %v627_v28 }
 0x1f0   : > { %v708_v42 = vmax.f32 %v670_v30, 0.0 }
 0x1f1   : > { %v709_v44 = vmax.f32 %v699_v34, 0.0 }
 0x1f5   : > { %v672_v29 = vpop.f32.mrf.mxu0 }
 0x1f6   : > { %v673_v31 = vadd.f32 %v672_v29, %v632_v27  ;;  %v701_v32 = vpop.f32.mrf.mxu1 }
 0x1f7   : > { %v702_v35 = vadd.f32 %v701_v32, %v632_v27 }
 0x1f8   : > { %v710_v37 = vmax.f32 %v673_v31, 0.0 }
 0x1f9   : > { %v711_v40 = vmax.f32 %v702_v35, 0.0 }
 0x1fa   : > { %734 = vmatpush.msra.mxu2 %v710_v37 }
 0x1fb   : > { %754 = vmatpush.msra.mxu3 %v711_v40 }
 0x1fc   : > { %735 = vmatpush.msra.mxu2 %v708_v42 }
 0x1fd   : > { %755 = vmatpush.msra.mxu3 %v709_v44 }
 0x1fe   : > { %736 = vmatpush.msra.mxu2 %v706_v45 }
 0x1ff   : > { %756 = vmatpush.msra.mxu3 %v707_v46 }
 0x200   : > { %737 = vmatpush.msra.mxu2 %v704_v47 }
 0x201   : > { %757 = vmatpush.msra.mxu3 %v705_v49  ;;  %947 = vmatmul.msk.f32.vlgmr.msra.gmra.mxu2 %vm527_vm2, %v712_v48 }
 0x202   : > { %948 = vmatmul.msk.f32.vlgmr.msra.gmra.mxu3 %vm527_vm2, %v712_v48 }
 0x284   : > { %v739_v51 = vpop.f32.mrf.mxu2 }
 0x285   : > { %v740_v52 = vadd.f32 %v739_v51, %v717_v50  ;;  %v759_v53 = vpop.f32.mrf.mxu3 }
 0x286   : > { %v760_v54 = vadd.f32 %v759_v53, %v717_v50 }
 0x287   : > { %v764_v55 = vand.u32 2147483647, %v740_v52  ;;  %v762_v15 = vmax.f32 %v740_v52, 0.0 }
 0x288   : > { %v765_v56 = vand.u32 2147483647, %v760_v54  ;;  %v763_v17 = vmax.f32 %v760_v54, 0.0 }
 0x289   : > { %v766_v57 = vsub.f32 0.0, %v764_v55 }
 0x28a   : > { %v767_v58 = vsub.f32 0.0, %v765_v56 }
 0x28b   : > { %v768_v59 = vmul.f32 1.442695, %v766_v57 }
 0x28c   : > { %v770_v60 = vmul.f32 1.442695, %v767_v58 }
 0x28d   : > { %1018 = vpow2.f32 %v768_v59 }
 0x28e   : > { %1020 = vpow2.f32 %v770_v60 }
 0x293   : > { %v1019_v61 = vpop.eup %1018 }
 0x294   : > { %v1021_v62 = vpop.eup %1020  ;;  %v772_v63 = vadd.f32 1.0, %v1019_v61  ;;  %v775_v0 = vmul.f32 -0.5, %v1019_v61  ;;  %v778_v5 = vand.u32 2147483647, %v1019_v61 }
 0x295   : > { %v781_v1 = vadd.f32 1.0, %v1021_v62  ;;  %v784_v2 = vmul.f32 -0.5, %v1021_v62  ;;  %v787_v7 = vand.u32 2147483647, %v1021_v62 }
 0x296   : > { %1022 = vlog2.f32 %v772_v63  ;;  %v776_v4 = vadd.f32 1.0, %v775_v0  ;;  %vm779_vm3 = vcmp.lt.f32.partialorder %v778_v5, 0.0004427343 }
 0x297   : > { %1024 = vlog2.f32 %v781_v1  ;;  %v785_v6 = vadd.f32 1.0, %v784_v2  ;;  %vm788_vm4 = vcmp.lt.f32.partialorder %v787_v7, 0.0004427343 }
 0x298   : > { %v777_v12 = vmul.f32 %v1019_v61, %v776_v4 }
 0x299   : > { %v786_v14 = vmul.f32 %v1021_v62, %v785_v6 }
 0x29c   : > { %v1023_v8 = vpop.eup %1022 }
 0x29d   : > { %v1025_v10 = vpop.eup %1024  ;;  %v774_v11 = vmul.f32 0.6931472, %v1023_v8 }
 0x29e   : > { %v783_v13 = vmul.f32 0.6931472, %v1025_v10 }
 0x29f   : > { %v780_v16 = vsel %vm779_vm3, %v777_v12, %v774_v11 }
 0x2a0   : > { %v789_v18 = vsel %vm788_vm4, %v786_v14, %v783_v13  ;;  %v790_v19 = vadd.f32 %v780_v16, %v762_v15 }
 0x2a1   : > { %v791_v20 = vadd.f32 %v789_v18, %v763_v17 }
 0x2a2   : > { %v795_v23 = vsel %vm794_vm5, %v740_v52, %v790_v19 }
 0x2a3   : > { %v796_v21 = vsel %vm794_vm5, %v760_v54, %v791_v20 }
 0x2a4   : > { %v799_v22 = vrot.slane %v796_v21, 4 }
 0x2a6   : > { %v801_v24 = vsel %vm800_vm6, %v795_v23, %v799_v22 }
 0x2a7   : > { %803 = vst [vmem:[%s365_s12] sm:$0xff] %v801_v24 }
 0x2a8   : > { %1053 = shalt.err (!%p1050_p5)
}
 0x2a9   : > { %959 = dma.vmem_to_hbm [thread:$0]  (%p1197_p4), %s821_s27, 128, %s823_s29, %s805_s28  }
 0x2aa PF: > { %p965_p6 = scmp.ge.s32.totalorder %s1104_s14, 2  ;;  %s834_s18 = sand.u32 1, %s1084_s30  }
 0x2ab   : > { %s835_s12 = scalar_lea.sflag [#allocation3], %s834_s18 }
 0x2ac   : > { %p962_p7 = pnand %p965_p6, %p1204_p8 }
 0x2ae   : > { %p963_p9 = pneg %p962_p7 }
 0x2b0   : > { %1079 = dma.done.wait (%p963_p9), %s835_s12, 128  }
 0x2b1   : > { %1081 = vsyncadd (%p963_p9), %s835_s12, 4294967168  ;;  %s22_s14 = sadd.s32 1, %s1104_s14   ;;  %s1365_s30 = smov %s1088_s10 }
 0x2b2   : > { %p19_p10 = scmp.ge.s32.totalorder %s22_s14, 4   ;;  %s1366_s10 = smov %s1092_s11 }
 0x2b3   : > { %s1367_s11 = smov %s1210_s22  ;;  %s1368_s12 = smov %s1100_s13 }
 0x2b4   : > { %s1369_s13 = smov %s1371_s17  ;;  %21 = sbr.rel (!%p19_p10) target bundleno = 4 (0x4), region = 94 }
 0x2b9   :  { %841 = vsyncpa [#allocation3], 1 }
 0x2ba   :  { %843 = vsyncpa [#allocation3 + $0x1], 1 }

</bundles_post_ra>
